<compile_context>
chip_gen: v5e
topology: v5e:2x2
jax: 0.10.0
libtpu: 0.0.40
codegen_flags: <defaults>
</compile_context>

<pallas_src>
import jax
import jax.numpy as jnp
from jax import lax
from jax.experimental import pallas as pl
from jax.experimental.pallas import tpu as pltpu


def _round_up(x, m):
    return ((x + m - 1) // m) * m


def _logits_kernel(x_ref, w_ref, b_ref, o_ref):
    # x_ref: (tm, H) VMEM (input dtype), w_ref: (1, H) VMEM (input dtype),
    # b_ref: (1,) SMEM f32, o_ref: (1, 1, tm) VMEM f32 (lane-dense logits).
    acc = lax.dot_general(
        w_ref[...], x_ref[...],
        dimension_numbers=(((1,), (1,)), ((), ())),
        preferred_element_type=jnp.float32,
    )  # (1, tm), f32 accumulation
    o_ref[0] = acc + b_ref[0]


def _project_rows(x_sel, weight, bias, tm):
    """x_sel: [Np, H] (Np % tm == 0) -> logits [Np] float32."""
    Np, H = x_sel.shape
    G = Np // tm
    out = pl.pallas_call(
        _logits_kernel,
        out_shape=jax.ShapeDtypeStruct((G, 1, tm), jnp.float32),
        grid_spec=pltpu.PrefetchScalarGridSpec(
            num_scalar_prefetch=0,
            grid=(G,),
            in_specs=[
                pl.BlockSpec((tm, H), lambda i: (i, 0)),             # row tile
                pl.BlockSpec((1, H), lambda i: (0, 0)),              # weight, lane-major, resident
                pl.BlockSpec(memory_space=pltpu.MemorySpace.SMEM),   # bias scalar
            ],
            out_specs=pl.BlockSpec((1, 1, tm), lambda i: (i, 0, 0)),  # lane-dense output
        ),
        compiler_params=pltpu.CompilerParams(
            dimension_semantics=("parallel",),
        ),
    )(x_sel, weight, bias)
    return out.reshape(Np)


def extractive_summary_head(last_hidden_state, cls_mask, weight, bias, tm=512):
    """Forward pass matching the PyTorch module.

    last_hidden_state: [B, S, H]
    cls_mask:          [B, S, 1] (or [B, S]) bool — selects CLS token rows
    weight:            [1, H]  (nn.Linear(hidden, 1).weight)
    bias:              [1]     (nn.Linear(hidden, 1).bias)
    returns:           [N] float32 logits, N = number of True mask rows
    """
    B, S, H = last_hidden_state.shape
    x_flat = last_hidden_state.reshape(B * S, H)

    if cls_mask.ndim == 3:
        row_mask = jnp.any(cls_mask, axis=-1)
    else:
        row_mask = cls_mask
    row_mask = row_mask.reshape(B * S)

    # torch.masked_select has a data-dependent output shape -> resolved eagerly
    # (outside jit), exactly like eager PyTorch.
    # TODO(synk): if this head must run under jax.jit, switch to
    # jnp.nonzero(..., size=max_sentences) + a validity mask (fixed max-N).
    idx = jnp.nonzero(row_mask)[0]
    N = int(idx.shape[0])
    if N == 0:
        return jnp.zeros((0,), dtype=jnp.float32)

    # Tile: multiple of 8 sublanes, no larger than the selected-row count needs.
    tm_eff = min(_round_up(tm, 8), _round_up(N, 8))
    Np = _round_up(N, tm_eff)

    # Gather only the selected rows before projecting (sparse mask => ~N*H
    # bytes of HBM traffic instead of B*S*H). Pad indices with row 0; the
    # corresponding garbage logits are sliced off below.
    idx_p = jnp.pad(idx, (0, Np - N))
    x_sel = jnp.take(x_flat, idx_p, axis=0)            # [Np, H], native dtype

    w = weight.reshape(1, H).astype(x_sel.dtype)        # already lane-major [1, H]
    b = bias.reshape(1).astype(jnp.float32)

    logits = _project_rows(x_sel, w, b, tm_eff)
    return logits[:N]


if __name__ == "__main__":
    key = jax.random.PRNGKey(0)
    k_x, k_w, k_b = jax.random.split(key, 3)

    B, S, H = 2, 8, 32  # batch, seq, hidden

    last_hidden_state = jax.random.normal(k_x, (B, S, H), dtype=jnp.float32)

    # Deterministic CLS mask: sentences start at tokens 0, 3, 5 in every batch.
    row_mask = jnp.zeros((B, S), dtype=bool).at[:, jnp.array([0, 3, 5])].set(True)
    cls_mask = row_mask[:, :, None]  # [B, S, 1], broadcastable over hidden

    # nn.Linear(hidden_size, 1) parameters, initialized deterministically.
    weight = jax.random.normal(k_w, (1, H), dtype=jnp.float32) * 0.05
    bias = jax.random.normal(k_b, (1,), dtype=jnp.float32) * 0.05

    logits = extractive_summary_head(last_hidden_state, cls_mask, weight, bias)
    logits = jax.block_until_ready(logits)

    # Pure-JAX reference of the exact PyTorch semantics.
    x_flat = last_hidden_state.reshape(B * S, H)
    enc_sent_embs = x_flat[row_mask.reshape(B * S)]        # masked_select + view(-1, H)
    ref = (enc_sent_embs @ weight.T + bias).reshape(-1)    # Linear(H, 1).view(-1)

    assert logits.shape == ref.shape, (logits.shape, ref.shape)
    assert jnp.allclose(logits, ref, atol=1e-5, rtol=1e-5), (
        "mismatch", logits, ref)

    print("KERNEL_OK")
</pallas_src>

<mosaic_0001>
module attributes {stable_mosaic.version = 11 : i64} {
  func.func @_logits_kernel(%arg0: i32, %arg1: memref<8x32xf32, #tpu.memory_space<vmem>>, %arg2: memref<1x32xf32, #tpu.memory_space<vmem>>, %arg3: memref<1xf32, #tpu.memory_space<smem>>, %arg4: memref<1x1x8xf32, #tpu.memory_space<vmem>>) attributes {dimension_semantics = [#tpu.dimension_semantics<parallel>], iteration_bounds = array<i64: 1>, scalar_prefetch = 0 : i64, scratch_operands = 0 : i64, tpu.core_type = #tpu.core_type<tc>, window_params = [{transform_indices = @transform_0, window_bounds = array<i64: 8, 32>}, {pipeline_mode = #tpu.pipeline_mode<synchronous>, transform_indices = @transform_1, window_bounds = array<i64: 1, 32>}, {transform_indices = @transform_2, window_bounds = array<i64: 1>}, {transform_indices = @transform_3, window_bounds = array<i64: 1, 1, 8>}]} {
    %c0 = arith.constant 0 : index
    %c0_0 = arith.constant 0 : index
    %0 = vector.load %arg2[%c0, %c0_0] : memref<1x32xf32, #tpu.memory_space<vmem>>, vector<1x32xf32>
    %c0_1 = arith.constant 0 : index
    %c0_2 = arith.constant 0 : index
    %1 = vector.load %arg1[%c0_1, %c0_2] : memref<8x32xf32, #tpu.memory_space<vmem>>, vector<8x32xf32>
    %cst = arith.constant dense<0.000000e+00> : vector<1x8xf32>
    %2 = tpu.matmul %0, %1, %cst {dimension_numbers = #tpu.dot_dimension_numbers<[1], [1], [0], [0], [0, 0, 1, 0], [], []>} : vector<1x32xf32>, vector<8x32xf32>, vector<1x8xf32> -> vector<1x8xf32>
    %c0_3 = arith.constant 0 : index
    %3 = memref.load %arg3[%c0_3] : memref<1xf32, #tpu.memory_space<smem>>
    %4 = vector.broadcast %3 : f32 to vector<1x8xf32>
    %5 = arith.addf %2, %4 : vector<1x8xf32>
    %c0_4 = arith.constant 0 : index
    %c0_5 = arith.constant 0 : index
    %c0_6 = arith.constant 0 : index
    %6 = vector.load %arg4[%c0_4, %c0_5, %c0_6] : memref<1x1x8xf32, #tpu.memory_space<vmem>>, vector<1x1x8xf32>
    %7 = vector.shape_cast %6 : vector<1x1x8xf32> to vector<1x8xf32>
    %8 = vector.shape_cast %5 : vector<1x8xf32> to vector<1x1x8xf32>
    tpu.vector_store %arg4[%c0_4, %c0_5, %c0_6], %8 {strides = array<i32>} : memref<1x1x8xf32, #tpu.memory_space<vmem>>, vector<1x1x8xf32>,
    return
  }
  func.func @transform_0(%arg0: i32) -> (i32, i32) {
    %c0_i32 = arith.constant 0 : i32
    %c0_i32_0 = arith.constant 0 : i32
    return %arg0, %c0_i32 : i32, i32
  }
  func.func @transform_1(%arg0: i32) -> (i32, i32) {
    %c0_i32 = arith.constant 0 : i32
    %c0_i32_0 = arith.constant 0 : i32
    %c0_i32_1 = arith.constant 0 : i32
    return %c0_i32, %c0_i32_0 : i32, i32
  }
  func.func @transform_2(%arg0: i32) -> i32 {
    %c0_i32 = arith.constant 0 : i32
    %c0_i32_0 = arith.constant 0 : i32
    return %c0_i32 : i32
  }
  func.func @transform_3(%arg0: i32) -> (i32, i32, i32) {
    %c0_i32 = arith.constant 0 : i32
    %c0_i32_0 = arith.constant 0 : i32
    %c0_i32_1 = arith.constant 0 : i32
    return %arg0, %c0_i32, %c0_i32_0 : i32, i32, i32
  }
}

</mosaic_0001>

<bundles_post_ra>
// kernel: tpu_custom_call.1
= control target key start
LH: loop header
LB: loop body
LE: loop exit
PB: predicated region body
PF: predicated region fallthrough
CT: control target
= control target key end

     0   :  { %9 = vsyncpa [#allocation4], 0  ;;  %s170_s0 = inlined_call_operand.hbm [shape: f32[8,32], index: 0, kind: input, shape index: {}]   ;;  %s171_s1 = inlined_call_operand.vmem [shape: f32[1,32], index: 1, kind: input, shape index: {}]   ;;  %s172_s2 = inlined_call_operand.<no memory space> [shape: f32[1], index: 2, kind: input, shape index: {}]   ;;  %s173_s3 = inlined_call_operand.hbm [shape: f32[1,1,8], index: 3, kind: output, shape index: {}]  }
   0x1   :  { %10 = vsyncpa [#allocation5], 0  ;;  %s16_s14 = sshll.u32 %s170_s0, 4  ;;  %s136_s15 = smov [#allocation3]   ;;  %s17_s14 = int_to_ptr.hbm [resolvable:$true] %s16_s14 }
   0x2   :  { %s18_s16 = sshll.u32 %s136_s15, 4  ;;  %s19_s16 = int_to_ptr.vmem [resolvable:$true] %s18_s16 }
   0x3   :  { %21 = dma.hbm_to_vmem [thread:$0]  %s17_s14, 128, %s19_s16, [#allocation4]  }
   0x4   :  { %132 = dma.done.wait [#allocation4], 128  }
   0x5   :  { %133 = vsyncadd [#allocation4], 4294967168  ;;  %vm34_vm0 = vcmask 261120   ;;  %v31_v0 = vld [vmem:[#allocation3] sm:$0xff]  ;;  %v33_v2 = vstv %s172_s2  ;;  %s137_s0 = smov [#allocation6]   ;;  %s70_s24 = sshll.u32 %s173_s3, 4  ;;  %s71_s24 = int_to_ptr.hbm [resolvable:$true] %s70_s24 }
   0x6   :  { %80 = vmatpush.xpose.msk.msra.mxu0 %vm34_vm0, %v31_v0  ;;  %v30_v1 = vld [vmem:[%s171_s1] sm:$0x1]  ;;  %s68_s21 = sshll.u32 %s137_s0, 4  ;;  %vm61_vm1 = vcmask 57344   ;;  %s69_s21 = int_to_ptr.vmem [resolvable:$true] %s68_s21 }
   0x9   :  { %81 = vmatmul.msk.f32.vlgmr.msra.gmra.mxu0 %vm34_vm0, %v30_v1 }
  0x86   :  { %v58_v3 = vpop.f32.mrf.mxu0 }
  0x87   :  { %v59_v4 = vadd.f32 %v58_v3, %v33_v2 }
  0x89   :  { %62 = vst.msk [vmem:[#allocation6] sm:$0x1] %vm61_vm1, %v59_v4 }
  0x8a   :  { %73 = dma.vmem_to_hbm [thread:$0]  %s69_s21, 16, %s71_s24, [#allocation5]  }
  0x8b   :  { %134 = dma.done.wait [#allocation5], 16  }
  0x8c   :  { %135 = vsyncadd [#allocation5], 4294967280 }
  0x8d   :  { %78 = vsyncpa [#allocation4], 1 }
  0x8e   :  { %79 = vsyncpa [#allocation5], 1 }

</bundles_post_ra>
